<compile_context>
chip_gen: v6e
topology: v6e:2x2x1
jax: 0.10.0
libtpu: 0.0.40
codegen_flags: <defaults>
</compile_context>

<pallas_src>
import functools

import jax
import jax.numpy as jnp
from jax.experimental import pallas as pl
from jax.experimental.pallas import tpu as pltpu


# ----------------------------- shared helpers ------------------------------

def _layernorm(x, gamma, beta, eps=1e-5):
    mu = jnp.mean(x, axis=-1, keepdims=True)
    var = jnp.mean((x - mu) ** 2, axis=-1, keepdims=True)
    return (x - mu) * jax.lax.rsqrt(var + eps) * gamma + beta


# Packed per-layer small-vector bundle layout (one DMA per layer step).
_VEC_FIELDS = ("ln1_g", "ln1_b", "b_qkv", "b_o", "ln2_g", "ln2_b", "b_fc",
               "b_proj")


def _vec_slices(D, M):
    sizes = {"ln1_g": D, "ln1_b": D, "b_qkv": 3 * D, "b_o": D,
             "ln2_g": D, "ln2_b": D, "b_fc": M, "b_proj": D}
    out, off = {}, 0
    for name in _VEC_FIELDS:
        out[name] = (off, off + sizes[name])
        off += sizes[name]
    return out, off


def _vmem_budget_bytes():
    # ~56 MiB on v7x (64 MiB physical), capped at 100 MiB on v5e/v6e (128 MiB).
    try:
        info = pltpu.get_tpu_info()
        cap = int(getattr(info, "vmem_capacity_bytes", 64 * 1024 * 1024))
    except Exception:  # pragma: no cover - defensive fallback
        cap = 64 * 1024 * 1024
    return min(cap * 7 // 8, 100 * 1024 * 1024)


def _pick_block_batch(B, target=8):
    # Largest divisor of B that is <= target.  (On v7x prefer choices that keep
    # B // Bt even so both TensorCores stay busy.)
    bt = 1
    for c in range(1, min(B, target) + 1):
        if B % c == 0:
            bt = c
    return bt


# ------------------------------- kernels ------------------------------------

def patch_embed_kernel(p_ref, w_ref, o_ref):
    # (N, C*P*P) @ (C*P*P, D) — the stride=P, kernel=P conv1 as a matmul.
    o_ref[...] = jnp.dot(p_ref[...], w_ref[...],
                         preferred_element_type=jnp.float32).astype(o_ref.dtype)


def encoder_stack_kernel(x_ref, pos_ref, lpre_g_ref, lpre_b_ref,
                         lpost_g_ref, lpost_b_ref, vec_ref,
                         wqkv_ref, wo_ref, wfc_ref, wproj_ref,
                         o_ref, resid_ref,
                         *, num_heads, seq_len, compute_dtype):
    """One grid step = (batch block i, layer l).

    The residual stream for the whole batch block lives in `resid_ref` (VMEM
    scratch, f32) across the layer axis; per layer the only HBM traffic is the
    layer's (bf16) weights + one packed vector bundle.
    """
    l = pl.program_id(1)
    n_layers = pl.num_programs(1)

    Bt, S_pad, D = x_ref.shape
    S2 = Bt * S_pad
    M = wfc_ref.shape[-1]
    dh = D // num_heads
    scale = 1.0 / float(dh) ** 0.5
    cdt = compute_dtype

    # Static head grouping: group width = 128 lanes when dh divides 128
    # (head pairs for ViT-B dh=64) so q/k/v slices and the fused group
    # out-projection are lane-aligned with contraction >= 128.
    if dh < 128 and 128 % dh == 0:
        hpg = min(num_heads, 128 // dh)
        while num_heads % hpg:
            hpg -= 1
    else:
        hpg = 1
    gw = hpg * dh
    n_groups = num_heads // hpg

    # ---- layer 0: positional add + ln_pre (cls prepend done in wrapper) -----
    @pl.when(l == 0)
    def _():
        xt = x_ref[...].astype(jnp.float32) + pos_ref[...]
        resid_ref[...] = _layernorm(xt, lpre_g_ref[...],
                                    lpre_b_ref[...]).reshape(S2, D)

    # Packed per-layer vectors (single DMA).
    slc, _ = _vec_slices(D, M)
    vec = vec_ref[...]                                    # (1, Ktot) f32

    def seg(name):
        a, b = slc[name]
        return vec[:, a:b]

    x = resid_ref[...]                                    # (S2, D) f32

    # ----------------------- multi-head self attention -----------------------
    h = _layernorm(x, seg("ln1_g"), seg("ln1_b")).astype(cdt)
    qkv = jnp.dot(h, wqkv_ref[...],
                  preferred_element_type=jnp.float32) + seg("b_qkv")  # (S2,3D)

    # mask padded key columns (tokens >= seq_len); hoisted out of all loops
    kidx = jax.lax.broadcasted_iota(jnp.int32, (1, S_pad), 1)
    key_bias = jnp.where(kidx < seq_len, 0.0, -1e30).astype(jnp.float32)

    attn_rows = []
    for b in range(Bt):                                   # attention per image
        r0 = b * S_pad                                    # 8-aligned sublanes
        q_b = qkv[r0:r0 + S_pad, 0:D]
        k_b = qkv[r0:r0 + S_pad, D:2 * D]
        v_b = qkv[r0:r0 + S_pad, 2 * D:3 * D]
        acc_b = jnp.zeros((S_pad, D), jnp.float32)
        for g in range(n_groups):                         # head groups
            go = g * gw
            ctx_parts = []
            for hh in range(hpg):                         # split in-register
                lo = go + hh * dh
                qh = q_b[:, lo:lo + dh].astype(cdt)
                kh = k_b[:, lo:lo + dh].astype(cdt)
                vh = v_b[:, lo:lo + dh].astype(cdt)
                s = jnp.dot(qh, kh.T,
                            preferred_element_type=jnp.float32) * scale
                s = s + key_bias
                s = s - jnp.max(s, axis=-1, keepdims=True)
                p = jnp.exp(s)
                # deferred normalization on the EUP; (S, dh) multiply not (S,S)
                inv = pl.reciprocal(jnp.sum(p, axis=-1, keepdims=True),
                                    approx=True)
                ctx_parts.append(
                    jnp.dot(p.astype(cdt), vh,
                            preferred_element_type=jnp.float32) * inv)
            ctx_g = (jnp.concatenate(ctx_parts, axis=-1)
                     if hpg > 1 else ctx_parts[0]).astype(cdt)   # (S_pad, gw)
            # fused group out-projection: contraction width gw (>=128 for ViT-B)
            acc_b = acc_b + jnp.dot(ctx_g, wo_ref[go:go + gw, :],
                                    preferred_element_type=jnp.float32)
        attn_rows.append(acc_b)
        # TODO(synk): for very large Bt / head counts, switch these static
        # loops to lax.fori_loop over a VMEM-staged qkv to bound live ranges.
    attn = jnp.concatenate(attn_rows, axis=0) if Bt > 1 else attn_rows[0]
    x = x + attn + seg("b_o")

    # ----------------------------- MLP (QuickGELU) ---------------------------
    # TODO(synk): if a large Bt does not fit v7x's 64 MiB VMEM, stream w_fc /
    # w_proj in M-dim chunks via an inner pipeline instead of whole slabs.
    h2 = _layernorm(x, seg("ln2_g"), seg("ln2_b")).astype(cdt)
    f = jnp.dot(h2, wfc_ref[...],
                preferred_element_type=jnp.float32) + seg("b_fc")
    f = f * jax.nn.sigmoid(1.702 * f)
    f = jnp.dot(f.astype(cdt), wproj_ref[...],
                preferred_element_type=jnp.float32) + seg("b_proj")
    x = x + f

    resid_ref[...] = x

    # ---- last layer: ln_post, write the (only) HBM output -------------------
    # Relies on the output block index being constant along the (arbitrary)
    # layer axis, so writeback happens once per batch block.
    @pl.when(l == n_layers - 1)
    def _():
        o_ref[...] = _layernorm(x, lpost_g_ref[...],
                                lpost_b_ref[...]).reshape(Bt, S_pad, D)


# ------------------------------ pallas wrappers ------------------------------

def patch_embed(patches, w_patch, *, out_dtype):
    # patches: (B, N, K); w_patch: (K, D) — both already in compute dtype.
    B, N, K = patches.shape
    D = w_patch.shape[1]
    return pl.pallas_call(
        patch_embed_kernel,
        out_shape=jax.ShapeDtypeStruct((B, N, D), out_dtype),
        grid=(B,),
        in_specs=[pl.BlockSpec((None, N, K), lambda b: (b, 0, 0)),
                  pl.BlockSpec((K, D), lambda b: (0, 0))],
        out_specs=pl.BlockSpec((None, N, D), lambda b: (b, 0, 0)),
        compiler_params=pltpu.CompilerParams(
            dimension_semantics=("parallel",)),
    )(patches, w_patch)


def encoder_stack(x, pos, lpre_g, lpre_b, lpost_g, lpost_b,
                  vecs, w_qkv, w_o, w_fc, w_proj, *,
                  num_heads, seq_len, block_batch, compute_dtype):
    """Fused: (pos add + ln_pre) -> L residual blocks -> ln_post.

    x: (B, S_pad, D) bf16 tokens (cls + patches, zero padded).
    vecs: (L, 1, Ktot) packed per-layer small vectors; w_*: stacked (L, ...)
    bf16 weights.  grid = (B // Bt, L): batch-block parallel, layer arbitrary.
    """
    B, S_pad, D = x.shape
    L = w_qkv.shape[0]
    M = w_fc.shape[2]
    Ktot = vecs.shape[-1]
    Bt = block_batch
    assert B % Bt == 0

    kern = functools.partial(encoder_stack_kernel, num_heads=num_heads,
                             seq_len=seq_len, compute_dtype=compute_dtype)

    def per_layer(r, c):          # stacked (L, r, c): pick layer l's slab
        return pl.BlockSpec((None, r, c), lambda i, l: (l, 0, 0))

    def const2d(r, c):            # broadcast params, fetched once
        return pl.BlockSpec((r, c), lambda i, l: (0, 0))

    return pl.pallas_call(
        kern,
        out_shape=jax.ShapeDtypeStruct((B, S_pad, D), jnp.float32),
        grid=(B // Bt, L),
        in_specs=[
            pl.BlockSpec((Bt, S_pad, D), lambda i, l: (i, 0, 0)),    # x
            const2d(S_pad, D),                                       # pos
            const2d(1, D), const2d(1, D),                            # ln_pre
            const2d(1, D), const2d(1, D),                            # ln_post
            per_layer(1, Ktot),                                      # packed vecs
            per_layer(D, 3 * D),                                     # w_qkv
            per_layer(D, D),                                         # w_o
            per_layer(D, M),                                         # w_fc
            per_layer(M, D),                                         # w_proj
        ],
        out_specs=pl.BlockSpec((Bt, S_pad, D), lambda i, l: (i, 0, 0)),
        scratch_shapes=[pltpu.VMEM((Bt * S_pad, D), jnp.float32)],
        compiler_params=pltpu.CompilerParams(
            dimension_semantics=("parallel", "arbitrary"),
            vmem_limit_bytes=_vmem_budget_bytes()),
    )(x, pos, lpre_g, lpre_b, lpost_g, lpost_b,
      vecs, w_qkv, w_o, w_fc, w_proj)


# ------------------------------ full forward ---------------------------------

def vlp_image_encoder_forward(image, params, *, patch, num_heads,
                              compute_dtype=jnp.bfloat16, block_batch=None):
    """image: (B, C, H, W) float32 (PyTorch NCHW).  Returns (B, 1+N, width)."""
    B, C, H, W = image.shape
    P = patch
    nH, nW = H // P, W // P
    N = nH * nW
    D = params["conv_w"].shape[0]
    M = params["layers"][0]["w_fc"].shape[1]
    assert D % num_heads == 0, "width must be divisible by num_heads"
    S = N + 1
    S_pad = ((S + 7) // 8) * 8          # 8-aligned token axis (sublane-dense)
    Bt = block_batch or _pick_block_batch(B)

    # conv1 (stride=P, kernel=P, no bias) == patchify + matmul (glue reshape)
    patches = image.reshape(B, C, nH, P, nW, P)
    patches = patches.transpose(0, 2, 4, 1, 3, 5).reshape(B, N, C * P * P)
    w_patch = params["conv_w"].reshape(D, C * P * P).T            # (K, D)
    xp = patch_embed(patches.astype(compute_dtype),
                     w_patch.astype(compute_dtype),
                     out_dtype=compute_dtype)                      # (B, N, D)

    # prepend class token + pad tokens (XLA glue); pos add, ln_pre, all L
    # blocks and ln_post happen inside one fused pallas_call.
    cls = jnp.broadcast_to(params["cls"].reshape(1, 1, D).astype(compute_dtype),
                           (B, 1, D))
    x = jnp.concatenate([cls, xp], axis=1)                         # (B, S, D)
    x = jnp.pad(x, ((0, 0), (0, S_pad - S), (0, 0)))
    pos = jnp.pad(params["pos"], ((0, S_pad - S), (0, 0)))         # f32

    # stacked per-layer weights (bf16) and one packed vector bundle per layer.
    def stack_w(name):
        return jnp.stack([lp[name] for lp in params["layers"]],
                         axis=0).astype(compute_dtype)
    w_qkv, w_o = stack_w("w_qkv"), stack_w("w_o")
    w_fc, w_proj = stack_w("w_fc"), stack_w("w_proj")
    vecs = jnp.stack([
        jnp.concatenate([lp[n].reshape(1, -1).astype(jnp.float32)
                         for n in _VEC_FIELDS], axis=-1)
        for lp in params["layers"]], axis=0)                       # (L,1,Ktot)
    _, ktot = _vec_slices(D, M)
    assert vecs.shape[-1] == ktot

    out = encoder_stack(x, pos,
                        params["ln_pre_g"], params["ln_pre_b"],
                        params["ln_post_g"], params["ln_post_b"],
                        vecs, w_qkv, w_o, w_fc, w_proj,
                        num_heads=num_heads, seq_len=S,
                        block_batch=Bt, compute_dtype=compute_dtype)
    return out[:, :S, :]


# ------------------------------ params / reference ---------------------------

def init_params(key, *, width, patch, in_ch, seq_len, n_layers, mlp_ratio=4):
    D, M = width, mlp_ratio * width
    keys = jax.random.split(key, 3 + 4 * n_layers)
    nrm = lambda k, s: (0.02 * jax.random.normal(k, s)).astype(jnp.float32)
    p = {
        "conv_w": nrm(keys[0], (D, in_ch, patch, patch)),
        "cls": nrm(keys[1], (D,)),
        "pos": nrm(keys[2], (seq_len, D)),
        "ln_pre_g": jnp.ones((1, D), jnp.float32),
        "ln_pre_b": jnp.zeros((1, D), jnp.float32),
        "ln_post_g": jnp.ones((1, D), jnp.float32),
        "ln_post_b": jnp.zeros((1, D), jnp.float32),
        "layers": [],
    }
    ki = 3
    for _ in range(n_layers):
        p["layers"].append({
            "ln1_g": jnp.ones((1, D), jnp.float32),
            "ln1_b": jnp.zeros((1, D), jnp.float32),
            "w_qkv": nrm(keys[ki + 0], (D, 3 * D)),
            "b_qkv": jnp.zeros((1, 3 * D), jnp.float32),
            "w_o": nrm(keys[ki + 1], (D, D)),
            "b_o": jnp.zeros((1, D), jnp.float32),
            "ln2_g": jnp.ones((1, D), jnp.float32),
            "ln2_b": jnp.zeros((1, D), jnp.float32),
            "w_fc": nrm(keys[ki + 2], (D, M)),
            "b_fc": jnp.zeros((1, M), jnp.float32),
            "w_proj": nrm(keys[ki + 3], (M, D)),
            "b_proj": jnp.zeros((1, D), jnp.float32),
        })
        ki += 4
    return p


def reference_forward(image, params, *, patch, num_heads):
    """Pure-jnp f32 reference mirroring the PyTorch forward semantics."""
    B, C, H, W = image.shape
    P = patch
    nH, nW = H // P, W // P
    N = nH * nW
    D = params["conv_w"].shape[0]
    patches = image.reshape(B, C, nH, P, nW, P)
    patches = patches.transpose(0, 2, 4, 1, 3, 5).reshape(B, N, C * P * P)
    x = patches @ params["conv_w"].reshape(D, -1).T
    cls = jnp.broadcast_to(params["cls"].reshape(1, 1, D), (B, 1, D))
    x = jnp.concatenate([cls, x], axis=1) + params["pos"][None]
    x = _layernorm(x, params["ln_pre_g"], params["ln_pre_b"])
    dh = D // num_heads
    for lp in params["layers"]:
        h = _layernorm(x, lp["ln1_g"], lp["ln1_b"])
        qkv = h @ lp["w_qkv"] + lp["b_qkv"]
        q, k, v = qkv[..., :D], qkv[..., D:2 * D], qkv[..., 2 * D:]
        rh = lambda t: t.reshape(B, -1, num_heads, dh).transpose(0, 2, 1, 3)
        q, k, v = rh(q), rh(k), rh(v)
        s = jnp.einsum("bhqd,bhkd->bhqk", q, k) / (dh ** 0.5)
        p = jax.nn.softmax(s, axis=-1)
        a = jnp.einsum("bhqk,bhkd->bhqd", p, v).transpose(0, 2, 1, 3)
        a = a.reshape(B, -1, D) @ lp["w_o"] + lp["b_o"]
        x = x + a
        h2 = _layernorm(x, lp["ln2_g"], lp["ln2_b"])
        f = h2 @ lp["w_fc"] + lp["b_fc"]
        f = f * jax.nn.sigmoid(1.702 * f)
        x = x + (f @ lp["w_proj"] + lp["b_proj"])
    return _layernorm(x, params["ln_post_g"], params["ln_post_b"])


# ----------------------------------- main ------------------------------------

if __name__ == "__main__":
    # Small synthetic ViT: width 64, 4 heads, 2 layers, 16x16 image, patch 4
    B, C, H, W = 2, 3, 16, 16
    PATCH, WIDTH, HEADS, LAYERS = 4, 64, 4, 2
    SEQ = (H // PATCH) * (W // PATCH) + 1            # 17 tokens (cls + patches)

    key = jax.random.PRNGKey(0)
    k_img, k_par = jax.random.split(key)
    image = jax.random.normal(k_img, (B, C, H, W), dtype=jnp.float32)
    params = init_params(k_par, width=WIDTH, patch=PATCH, in_ch=C,
                         seq_len=SEQ, n_layers=LAYERS)

    out = vlp_image_encoder_forward(image, params, patch=PATCH,
                                    num_heads=HEADS,
                                    compute_dtype=jnp.bfloat16)
    out = jax.block_until_ready(out)

    ref = jax.block_until_ready(
        reference_forward(image, params, patch=PATCH, num_heads=HEADS))

    assert out.shape == (B, SEQ, WIDTH), out.shape
    max_err = float(jnp.max(jnp.abs(out - ref)))
    assert jnp.allclose(out, ref, atol=3e-2, rtol=3e-2), max_err

    # TODO(synk): `self.fc = nn.Linear(dim_out, emb_dim)` is defined in
    # __init__ but never used in forward(), so it is intentionally omitted.
    # TODO(synk): CLIP pretrained weights (clip.load) are replaced by random
    # init; load real ViT-B/16 weights into `params` for production use.
    print("KERNEL_OK")
</pallas_src>

<mosaic_0001>
module attributes {stable_mosaic.version = 11 : i64} {
  func.func @patch_embed_kernel(%arg0: i32, %arg1: memref<1x16x48xbf16, #tpu.memory_space<vmem>>, %arg2: memref<48x64xbf16, #tpu.memory_space<vmem>>, %arg3: memref<1x16x64xbf16, #tpu.memory_space<vmem>>) attributes {dimension_semantics = [#tpu.dimension_semantics<parallel>], iteration_bounds = array<i64: 2>, scalar_prefetch = 0 : i64, scratch_operands = 0 : i64, tpu.core_type = #tpu.core_type<tc>, window_params = [{transform_indices = @transform_0, window_bounds = array<i64: 1, 16, 48>}, {pipeline_mode = #tpu.pipeline_mode<synchronous>, transform_indices = @transform_1, window_bounds = array<i64: 48, 64>}, {transform_indices = @transform_2, window_bounds = array<i64: 1, 16, 64>}]} {
    %c0 = arith.constant 0 : index
    %c0_0 = arith.constant 0 : index
    %c0_1 = arith.constant 0 : index
    %0 = vector.load %arg1[%c0, %c0_0, %c0_1] : memref<1x16x48xbf16, #tpu.memory_space<vmem>>, vector<1x16x48xbf16>
    %1 = vector.shape_cast %0 : vector<1x16x48xbf16> to vector<16x48xbf16>
    %c0_2 = arith.constant 0 : index
    %c0_3 = arith.constant 0 : index
    %2 = vector.load %arg2[%c0_2, %c0_3] : memref<48x64xbf16, #tpu.memory_space<vmem>>, vector<48x64xbf16>
    %cst = arith.constant dense<0.000000e+00> : vector<16x64xf32>
    %3 = tpu.matmul %1, %2, %cst {dimension_numbers = #tpu.dot_dimension_numbers<[1], [0], [0], [1], [0, 0, 1, 1], [], []>} : vector<16x48xbf16>, vector<48x64xbf16>, vector<16x64xf32> -> vector<16x64xf32>
    %4 = arith.truncf %3 : vector<16x64xf32> to vector<16x64xbf16>
    %c0_4 = arith.constant 0 : index
    %c0_5 = arith.constant 0 : index
    %c0_6 = arith.constant 0 : index
    %5 = vector.load %arg3[%c0_4, %c0_5, %c0_6] : memref<1x16x64xbf16, #tpu.memory_space<vmem>>, vector<1x16x64xbf16>
    %6 = vector.shape_cast %5 : vector<1x16x64xbf16> to vector<16x64xbf16>
    %7 = vector.shape_cast %4 : vector<16x64xbf16> to vector<1x16x64xbf16>
    tpu.vector_store %arg3[%c0_4, %c0_5, %c0_6], %7 {strides = array<i32>} : memref<1x16x64xbf16, #tpu.memory_space<vmem>>, vector<1x16x64xbf16>,
    return
  }
  func.func @transform_0(%arg0: i32) -> (i32, i32, i32) {
    %c0_i32 = arith.constant 0 : i32
    %c0_i32_0 = arith.constant 0 : i32
    %c0_i32_1 = arith.constant 0 : i32
    return %arg0, %c0_i32, %c0_i32_0 : i32, i32, i32
  }
  func.func @transform_1(%arg0: i32) -> (i32, i32) {
    %c0_i32 = arith.constant 0 : i32
    %c0_i32_0 = arith.constant 0 : i32
    %c0_i32_1 = arith.constant 0 : i32
    return %c0_i32, %c0_i32_0 : i32, i32
  }
  func.func @transform_2(%arg0: i32) -> (i32, i32, i32) {
    %c0_i32 = arith.constant 0 : i32
    %c0_i32_0 = arith.constant 0 : i32
    %c0_i32_1 = arith.constant 0 : i32
    return %arg0, %c0_i32, %c0_i32_0 : i32, i32, i32
  }
}

</mosaic_0001>

<bundles_post_ra>
// kernel: tpu_custom_call.1
= control target key start
LH: loop header
LB: loop body
LE: loop exit
PB: predicated region body
PF: predicated region fallthrough
CT: control target
= control target key end

     0   :  { %7 = vsyncpa [#allocation3], 0  ;;  %s801_s0 = inlined_call_operand.hbm [shape: bf16[2,16,48], index: 0, kind: input, shape index: {}]   ;;  %s802_s1 = inlined_call_operand.hbm [shape: bf16[48,64], index: 1, kind: input, shape index: {}]   ;;  %s803_s2 = inlined_call_operand.hbm [shape: bf16[2,16,64], index: 2, kind: output, shape index: {}]  }
   0x1   :  { %9 = vsyncpa [#allocation3 + $0x1], 0 }
   0x2   :  { %10 = vsyncpa [#allocation6], 0 }
   0x3   :  { %11 = vsyncpa [#allocation4], 0 }
   0x4   :  { %13 = vsyncpa [#allocation4 + $0x1], 0  ;;  %s618_s9 = smov 0   ;;  %s620_s10 = smov 0  }
   0x5   :  { %s622_s11 = smov 0   ;;  %s624_s12 = smov 0  }
   0x6 LB: > { %s639_s13 = sadd.s32 4294967295, %s592_s12   ;;  %s362_s14 = sadd.s32 4294967294, %s592_s12   ;;  %s592_s12 = sphi %s624_s12, %s825_s12   ;;  %s588_s11 = sphi %s622_s11, %s824_s11   ;;  %s584_s10 = sphi %s620_s10, %s823_s10   ;;  %s580_s9 = sphi %s618_s9, %s822_s9  }
   0x7   : > { %p39_p0 = scmp.ne.s32.totalorder %s584_s10, %s580_s9  ;;  %p804_p1 = scmp.eq.s32.totalorder %s639_s13, 0 }
   0x8   : > { %p90_p3 = scmp.eq.s32.totalorder %s362_s14, 1  ;;  %p363_p5 = scmp.ge.s32.totalorder %s592_s12, 1 }
   0x9   : > { %p648_p4 = por %p804_p1, %p39_p0  ;;  %p97_p7 = scmp.lt.s32.totalorder %s592_s12, 3 }
   0xa   : > { %p653_p6 = por %p90_p3, %p39_p0  ;;  %s594_s18 = smov [#allocation5]  }
   0xb   : > { %s808_s15 = scalar_select %p648_p4, 1, 0 }
   0xc   : > { %s809_s16 = scalar_select %p653_p6, 1, 0 }
   0xd   : > { %p658_p8 = pnand %p363_p5, %p97_p7  ;;  %s109_s19 = sshll.u32 %s594_s18, 4  ;;  %s110_s19 = int_to_ptr.vmem [resolvable:$true] %s109_s19 }
   0xe   : > { %s672_s21 = sadd.s32 1, %s592_s12   ;;  %s26_s22 = sadd.s32 1, %s588_s11 }
   0xf   : > { %s810_s17 = scalar_select %p658_p8, 1, 0 }
  0x10   : > { %p411_p9 = pneg %p658_p8  ;;  %s23_s23 = ssub.s32 %s592_s12, %s672_s21 }
  0x11   : > { %s481_s24 = scalar_lea.vmem %s110_s19, 384  ;;  %p489_p5 = scmp.lt.s32.totalorder %s110_s19, %s110_s19 }
  0x12   : > { %p667_p11 = pnand %p411_p9, %p804_p1  ;;  %p482_p13 = scmp.ne.s32.totalorder %s110_s19, %s481_s24 }
  0x13   : > { %p490_p7 = scmp.lt.s32.totalorder %s481_s24, %s481_s24 }
  0x14   : > { %p472_p12 = pneg %p667_p11 }
  0x15   : > { %p491_p10 = por %p490_p7, %p489_p5 }
  0x16   : > { %p484_p0 = pnand %p482_p13, %p472_p12 }
  0x18   : > { %p485_p3 = pneg %p484_p0 }
  0x1a   : > { %p492_p2 = pnand %p491_p10, %p485_p3 }
  0x1c   : > { %495 = shalt.err (!%p492_p2)
}
  0x1d   : > { %s595_s25 = smov 64   ;;  %s596_s26 = smov 4  }
  0x1e   : > { %414 = dma.hbm_to_vmem [thread:$0]  (!%p667_p11), %s802_s1, 384, %s110_s19, [#allocation6], %s595_s25, %s595_s25, %s596_s26  }
  0x1f   : > { %p24_p2 = scmp.eq.s32.totalorder %s23_s23, 0  ;;  %p33_p9 = scmp.ne.s32.totalorder %s588_s11, %s584_s10 }
  0x20   : > { %p34_p10 = scmp.eq.s32.totalorder %s592_s12, 0  ;;  %p424_p12 = scmp.lt.s32.totalorder %s592_s12, 2 }
  0x21   : > { %s692_s29 = scalar_select %p24_p2, %s588_s11, %s26_s22  }
  0x22   : > { %p35_p13 = por %p34_p10, %p33_p9  ;;  %p812_p0 = scmp.eq.s32.totalorder %s639_s13, 1 }
  0x23   : > { %s123_s3 = sand.u32 1, %s588_s11   ;;  %s385_s4 = sshll.u32 %s592_s12, 7 }
  0x24   : > { %p696_p3 = por %p812_p0, %p33_p9  ;;  %s366_s5 = sshll.u32 %s123_s3, 3 }
  0x25   : > { %s705_s8 = scalar_lea.hbm %s801_s0, %s385_s4  ;;  %s127_s14 = scalar_lea.vmem [#allocation2], %s366_s5 }
  0x26   : > { %s813_s30 = scalar_select %p696_p3, 1, 0 }
  0x27   : > { %s134_s18 = sshll.u32 %s127_s14, 4  ;;  %p707_p11 = pnand %p424_p12, %p35_p13  ;;  %s711_s18 = int_to_ptr.vmem [resolvable:$true] %s134_s18 }
  0x28   : > { %s713_s20 = scalar_lea.sflag [#allocation3], %s123_s3  ;;  %s496_s22 = scalar_lea.hbm %s705_s8, 128 }
  0x29   : > { %p497_p5 = scmp.ne.s32.totalorder %s705_s8, %s496_s22  ;;  %p498_p7 = pneg %p707_p11 }
  0x2a   : > { %s501_s27 = scalar_lea.hbm %s801_s0, 256  ;;  %p502_p10 = scmp.lt.s32.totalorder %s705_s8, %s801_s0 }
  0x2b   : > { %p499_p2 = pnand %p498_p7, %p497_p5  ;;  %p503_p12 = scmp.lt.s32.totalorder %s501_s27, %s496_s22 }
  0x2d   : > { %p500_p9 = pneg %p499_p2  ;;  %p504_p13 = por %p503_p12, %p502_p10 }
  0x2f   : > { %p505_p0 = pnand %p504_p13, %p500_p9 }
  0x31   : > { %508 = shalt.err (!%p505_p0)
}
  0x32   : > { %s509_s3 = scalar_lea.vmem %s711_s18, 128  ;;  %s597_s5 = smov [#allocation2]  }
  0x33   : > { %p510_p1 = scmp.ne.s32.totalorder %s711_s18, %s509_s3  ;;  %s514_s6 = sshll.u32 %s597_s5, 4  ;;  %s515_s6 = int_to_ptr.vmem [resolvable:$false] %s514_s6 }
  0x34   : > { %s516_s7 = scalar_lea.vmem %s515_s6, 256  ;;  %p517_p2 = scmp.lt.s32.totalorder %s711_s18, %s515_s6 }
  0x35   : > { %p512_p6 = pnand %p510_p1, %p498_p7  ;;  %p518_p3 = scmp.lt.s32.totalorder %s516_s7, %s509_s3 }
  0x37   : > { %p513_p5 = pneg %p512_p6  ;;  %p519_p4 = por %p518_p3, %p517_p2 }
  0x39   : > { %p520_p8 = pnand %p519_p4, %p513_p5 }
  0x3b   : > { %523 = shalt.err (!%p520_p8)
}
  0x3c   : > { %418 = dma.hbm_to_vmem [thread:$0]  (!%p707_p11), %s705_s8, 128, %s711_s18, %s713_s20, %s595_s25, %s595_s25, %s596_s26  }
  0x3d   : > { %p815_p1 = scmp.ne.s32.totalorder %s810_s17, 0 }
  0x3e   : > { %s740_s14 = sand.u32 (!%p815_p1), 1, %s584_s10   ;;  %p816_p4 = scmp.ne.s32.totalorder (!%p815_p1), %s808_s15, 0 }
  0x3f   : > { %146 = sbr.rel (%p815_p1) target bundleno = 298 (0x12a), region = 28  ;;  %s370_s22 = sshll.u32 (!%p815_p1), %s740_s14, 3 }
  0x40   : > { %s149_s23 = scalar_lea.sflag (!%p815_p1), [#allocation3], %s740_s14  ;;  %s152_s24 = scalar_lea.vmem (!%p815_p1), [#allocation2], %s370_s22 }
  0x44   : > { %567 = dma.done.wait (%p816_p4), %s149_s23, 128  }
  0x45   : > { %569 = vsyncadd (%p816_p4), %s149_s23, 4294967168  ;;  %p817_p6 = scmp.eq.s32.totalorder %s639_s13, 0 }
  0x47   : > { %571 = dma.done.wait (%p817_p6), [#allocation6], 384   ;;  %p818_p8 = pmov %p817_p6 }
  0x48   : > { %v598_v0 = vmov 0.0   ;;  %vm599_vm0 = vmmov 0   ;;  %v466_v1 = vld [vmem:[#allocation5 + $0x10] sm:$0xff]   ;;  %v467_v2 = vld [vmem:[#allocation5 + $0x8] sm:$0xff]   ;;  %v468_v3 = vld [vmem:[#allocation5] sm:$0xff]   ;;  %vm209_vm1 = vcmask 392192  }
  0x49   : > { %573 = vsyncadd (%p818_p8), [#allocation6], 4294966912  ;;  %393 = vmatprep.subr.bf16.mxu0 %v598_v0  ;;  %399 = vmatprep.mubr.msk.bf16.mxu0 %vm599_vm0, %v598_v0  ;;  %v469_v4 = vld [vmem:[%s152_s24] sm:$0xff]   ;;  %vm262_vm2 = vcmask 519168   ;;  %s176_s15 = scalar_lea.vmem [#allocation7], %s370_s22  ;;  %s388_s25 = sshll.u32 %s639_s13, 7 }
  0x4a   : > { %394 = vmatpush3.bf16.msra.mxu0 %v466_v1  ;;  %s279_s17 = sshll.u32 %s176_s15, 4  ;;  %s758_s18 = scalar_lea.hbm %s803_s2, %s388_s25  ;;  %s753_s17 = int_to_ptr.vmem [resolvable:$true] %s279_s17 }
  0x4b   : > { %395 = vmatprep.subr.bf16.mxu0 %v598_v0  ;;  %s266_s19 = scalar_lea.sflag [#allocation4], %s740_s14  ;;  %s524_s20 = scalar_lea.vmem %s753_s17, 128 }
  0x4c   : > { %p525_p3 = scmp.ne.s32.totalorder %s753_s17, %s524_s20  ;;  %p819_p11 = scmp.ne.s32.totalorder %s813_s30, 0 }
  0x4d   : > { %s600_s13 = smov [#allocation7]  }
  0x4e   : > { %396 = vmatpush3.bf16.msra.mxu0 %v467_v2  ;;  %p526_p7 = pnand %p525_p3, %p819_p11  ;;  %s528_s27 = sshll.u32 %s600_s13, 4  ;;  %s529_s27 = int_to_ptr.vmem [resolvable:$false] %s528_s27 }
  0x4f   : > { %397 = vmatprep.subr.bf16.mxu0 %v598_v0  ;;  %s530_s28 = scalar_lea.vmem %s529_s27, 256  ;;  %p531_p10 = scmp.lt.s32.totalorder %s753_s17, %s529_s27 }
  0x50   : > { %p527_p9 = pneg %p526_p7  ;;  %p532_p12 = scmp.lt.s32.totalorder %s530_s28, %s524_s20 }
  0x52   : > { %398 = vmatpush3.bf16.msra.mxu0 %v468_v3  ;;  %p533_p13 = por %p532_p12, %p531_p10 }
  0x54   : > { %p534_p0 = pnand %p533_p13, %p527_p9 }
  0x55   : > { %400 = vmatmul.mubr.msk.bf16.vlgmr.msra.gmra.mxu0 %vm209_vm1, %v469_v4 }
 0x115   : > { %v247_v5 = vpop.f32.mrf.mxu0 }
 0x116   : > { %v386_v6 = vpack.c.bf16 %v247_v5, %v247_v5 }
 0x117   : > { %v401_v7 = vpop.f32.mrf.mxu0 }
 0x118   : > { %263 = vst.msk [vmem:[%s176_s15] sm:$0xf] %vm262_vm2, %v386_v6 }
 0x119   : > { %v250_v8 = vpop.f32.mrf.mxu0 }
 0x11a   : > { %v387_v9 = vpack.c.bf16 %v250_v8, %v250_v8 }
 0x11b   : > { %v402_v10 = vpop.f32.mrf.mxu0 }
 0x11c   : > { %264 = vst.msk [vmem:[%s176_s15 + $0x4] sm:$0xf] %vm262_vm2, %v387_v9 }
 0x11d   : > { %537 = shalt.err (!%p534_p0)
}
 0x11e   : > { %s538_s4 = scalar_lea.hbm %s758_s18, 128  ;;  %s542_s6 = scalar_lea.hbm %s803_s2, 256 }
 0x11f   : > { %p539_p5 = scmp.ne.s32.totalorder %s758_s18, %s538_s4  ;;  %p543_p4 = scmp.lt.s32.totalorder %s758_s18, %s803_s2 }
 0x120   : > { %p544_p6 = scmp.lt.s32.totalorder %s542_s6, %s538_s4 }
 0x121   : > { %p540_p2 = pnand %p539_p5, %p819_p11 }
 0x122   : > { %p545_p8 = por %p544_p6, %p543_p4 }
 0x123   : > { %p541_p1 = pneg %p540_p2 }
 0x125   : > { %p546_p3 = pnand %p545_p8, %p541_p1 }
 0x127   : > { %549 = shalt.err (!%p546_p3)
}
 0x128   : > { %s601_s23 = smov 64   ;;  %s602_s24 = smov 4  }
 0x129   : > { %409 = dma.vmem_to_hbm [thread:$0]  (%p819_p11), %s753_s17, 128, %s758_s18, %s266_s19, %s601_s23, %s601_s23, %s602_s24  }
 0x12a PF: > { %s294_s15 = sand.u32 1, %s580_s9   ;;  %p820_p7 = scmp.ne.s32.totalorder %s809_s16, 0 }
 0x12b   : > { %p821_p9 = scmp.ge.s32.totalorder %s592_s12, 2  ;;  %s295_s25 = scalar_lea.sflag [#allocation4], %s294_s15 }
 0x12d   : > { %p420_p10 = pnand %p821_p9, %p820_p7 }
 0x12f   : > { %p421_p12 = pneg %p420_p10 }
 0x131   : > { %575 = dma.done.wait (%p421_p12), %s295_s25, 128  }
 0x132   : > { %577 = vsyncadd (%p421_p12), %s295_s25, 4294967168  ;;  %p16_p13 = scmp.ge.s32.totalorder %s672_s21, 4   ;;  %s822_s9 = smov %s584_s10 }
 0x133   : > { %s823_s10 = smov %s588_s11  ;;  %s824_s11 = smov %s692_s29 }
 0x134   : > { %s825_s12 = smov %s672_s21  ;;  %18 = sbr.rel (!%p16_p13) target bundleno = 6 (0x6), region = 77 }
 0x139   :  { %300 = vsyncpa [#allocation3], 1 }
 0x13a   :  { %302 = vsyncpa [#allocation3 + $0x1], 1 }
 0x13b   :  { %303 = vsyncpa [#allocation6], 1 }
 0x13c   :  { %304 = vsyncpa [#allocation4], 1 }
 0x13d   :  { %306 = vsyncpa [#allocation4 + $0x1], 1 }

</bundles_post_ra>
